<compile_context>
chip_gen: v7x
topology: tpu7x:2x2x1
jax: 0.10.0
libtpu: 0.0.40
codegen_flags: <defaults>
</compile_context>

<pallas_src>
import jax
import jax.numpy as jnp
from jax.experimental import pallas as pl
from jax.experimental.pallas import tpu as pltpu

FEATURES = 512       # ENCODERS['resnet18']['features']
N_CLASSES = 10
DROPOUT_RATE = 0.2   # identity at inference time

LANE = 128
SUBLANE = 8


def _round_up(x, m):
    return ((x + m - 1) // m) * m


def _pick_b_tile(B, HW, F):
    """Pick a batch tile: multiple of 8, divides round_up(B, 8), targets multi-MiB
    bf16 feature blocks, and prefers >= 2 grid steps (v7x has 2 TensorCores)."""
    B8 = _round_up(B, SUBLANE)
    bytes_per_b = HW * F * 2                                  # bf16 bytes per batch row
    cap = min(B8, max(SUBLANE, ((4 << 20) // bytes_per_b) // SUBLANE * SUBLANE))
    divisors = [d for d in range(SUBLANE, B8 + 1, SUBLANE) if B8 % d == 0]
    fitting = [d for d in divisors if d <= cap] or [SUBLANE]
    b_tile = max(fitting)
    if B8 // b_tile < 2:                                      # give both v7x cores work
        multi = [d for d in fitting if B8 // d >= 2]
        if multi:
            b_tile = max(multi)
    return b_tile, B8


# ----------------------------- Pallas head kernel ---------------------------
def head_kernel(x_ref, w_ref, b_ref, o_ref):
    """Fused global-average-pool + linear for one batch tile.

    x_ref: [b_tile*HW, F]  bf16 feature slab (rows i*HW .. i*HW+HW-1 = batch row i)
    w_ref: [F, C_pad]      bf16 fc weight, pre-scaled by 1/HW, class-padded to 128
    b_ref: [1, C_pad]      f32 fc bias, class-padded
    o_ref: [b_tile, C_pad] f32 logits (lane-dense store)
    """
    bt, cp = o_ref.shape
    hw = x_ref.shape[0] // bt
    # Pool-as-matmul: bf16 x bf16 with f32 accumulation on the MXU (1/HW folded
    # into w), then sum each batch row's HW partial results (small f32 slab).
    y = jnp.dot(x_ref[...], w_ref[...], preferred_element_type=jnp.float32)
    pooled = jnp.sum(y.reshape(bt, hw, cp), axis=1)
    # Dropout(0.2) in eval mode == identity.
    o_ref[...] = pooled + b_ref[...]


def signs_classifier_head(feats_bhwf, weight_fc, bias_c):
    """feats_bhwf: [B, H*W, F] bf16 features; weight_fc: [F, C]; bias_c: [C]
    -> [B, C] f32 logits."""
    B, HW, F = feats_bhwf.shape
    C = weight_fc.shape[1]

    b_tile, B_pad = _pick_b_tile(B, HW, F)
    C_pad = _round_up(C, LANE)                     # lane-dense output

    feats = feats_bhwf.astype(jnp.bfloat16)        # no-op: encoder already emits bf16
    if B_pad != B:
        # Only the <=7-row pad to the next sublane multiple; no full-tensor cast copy.
        feats = jnp.pad(feats, ((0, B_pad - B), (0, 0), (0, 0)))
    feats2d = feats.reshape(B_pad * HW, F)         # contiguous (free) reshape

    # Fold 1/HW pooling scale into the weight, pad classes to 128 lanes, cast to
    # bf16 for a single-pass MXU matmul; bias stays f32.
    w = jnp.pad(weight_fc * (1.0 / HW), ((0, 0), (0, C_pad - C))).astype(jnp.bfloat16)
    b = jnp.pad(bias_c, (0, C_pad - C)).astype(jnp.float32).reshape(1, C_pad)

    # Explicit VMEM budget (double-buffered feature tile dominates); keeps large
    # tiles legal on v5e's 16 MiB scoped default and v7x's 64 MiB physical VMEM.
    feat_tile = b_tile * HW * F * 2
    need = (2 * feat_tile + 2 * F * C_pad * 2 + 2 * b_tile * C_pad * 4
            + b_tile * HW * C_pad * 4 + 2 * C_pad * 4)
    vmem_limit = int(min(48 << 20, max(2 * need, 16 << 20)))

    grid = (B_pad // b_tile,)
    out = pl.pallas_call(
        head_kernel,
        out_shape=jax.ShapeDtypeStruct((B_pad, C_pad), jnp.float32),
        grid_spec=pltpu.PrefetchScalarGridSpec(
            num_scalar_prefetch=0,
            grid=grid,
            in_specs=[
                pl.BlockSpec((b_tile * HW, F), lambda i: (i, 0)),
                pl.BlockSpec((F, C_pad), lambda i: (0, 0)),
                pl.BlockSpec((1, C_pad), lambda i: (0, 0)),
            ],
            out_specs=pl.BlockSpec((b_tile, C_pad), lambda i: (i, 0)),
        ),
        compiler_params=pltpu.CompilerParams(
            dimension_semantics=("parallel",),
            vmem_limit_bytes=vmem_limit),
    )(feats2d, w, b)
    return out[:B, :C]


# ------------------------- stand-in encoder (plain JAX glue) ----------------
def standin_encoder_forward_features(x_nchw, w_proj, b_proj):
    """Deterministic stand-in for `encoder.forward_features` (resnet18).

    Returns features in the kernel layout [B, H*W, FEATURES], bf16 at the source
    so the head kernel reads bf16 HBM with no extra pad+cast copy.
    """
    # TODO(synk): the pretrained resnet18 backbone has no self-contained Pallas
    # equivalent; this stride-4 1x1-conv + ReLU stand-in reproduces only the
    # interface (NCHW image -> feature map with 512 channels).
    x_ds = x_nchw[:, :, ::4, ::4]                                       # [B, 3, 4, 4]
    B, Cin, H, W = x_ds.shape
    x_flat = jnp.transpose(x_ds, (0, 2, 3, 1)).reshape(B, H * W, Cin)   # [B, HW, 3]
    feats = jax.nn.relu(jnp.einsum('bpc,cf->bpf', x_flat, w_proj) + b_proj)
    return feats.astype(jnp.bfloat16)                                   # [B, HW, 512]


def signs_classifier_forward(x_nchw, params):
    feats = standin_encoder_forward_features(
        x_nchw, params["enc_w"], params["enc_b"])                       # [B, HW, F] bf16
    return signs_classifier_head(feats, params["fc_w"], params["fc_b"])


# --------------------------------- driver ------------------------------------
if __name__ == "__main__":
    key = jax.random.PRNGKey(0)
    k_x, k_ew, k_eb, k_fw, k_fb = jax.random.split(key, 5)

    # Input image, NCHW like PyTorch.
    x = jax.random.normal(k_x, (2, 3, 16, 16), dtype=jnp.float32)

    # Deterministic parameter init (shapes from __init__ with resnet18 / n_classes=10).
    params = {
        # stand-in encoder projection 3 -> 512
        "enc_w": jax.random.normal(k_ew, (3, FEATURES), dtype=jnp.float32) * 0.1,
        "enc_b": jax.random.normal(k_eb, (FEATURES,), dtype=jnp.float32) * 0.01,
        # fc: nn.Linear(512, n_classes).weight is [C, F]; we store it transposed [F, C]
        "fc_w": jax.random.normal(k_fw, (FEATURES, N_CLASSES), dtype=jnp.float32) * 0.02,
        "fc_b": jax.random.normal(k_fb, (N_CLASSES,), dtype=jnp.float32) * 0.01,
    }

    logits = jax.block_until_ready(signs_classifier_forward(x, params))

    # Pure-JAX reference: same bf16 features and same bf16 folded-scale weight,
    # f32 accumulation (only accumulation order differs from the kernel).
    feats_ref = standin_encoder_forward_features(x, params["enc_w"], params["enc_b"])
    HW = feats_ref.shape[1]
    w_ref = (params["fc_w"] * (1.0 / HW)).astype(jnp.bfloat16).astype(jnp.float32)
    logits_ref = jnp.einsum('bpf,fc->bc', feats_ref.astype(jnp.float32), w_ref) \
        + params["fc_b"]

    assert logits.shape == (2, N_CLASSES), logits.shape
    assert jnp.allclose(logits, logits_ref, atol=1e-3, rtol=1e-3), (
        jnp.max(jnp.abs(logits - logits_ref)))

    print("KERNEL_OK")
</pallas_src>

<mosaic_0001>
module attributes {stable_mosaic.version = 11 : i64} {
  func.func @head_kernel(%arg0: i32, %arg1: memref<128x512xbf16, #tpu.memory_space<vmem>>, %arg2: memref<512x128xbf16, #tpu.memory_space<vmem>>, %arg3: memref<1x128xf32, #tpu.memory_space<vmem>>, %arg4: memref<8x128xf32, #tpu.memory_space<vmem>>) attributes {dimension_semantics = [#tpu.dimension_semantics<parallel>], iteration_bounds = array<i64: 1>, scalar_prefetch = 0 : i64, scratch_operands = 0 : i64, tpu.core_type = #tpu.core_type<tc>, window_params = [{transform_indices = @transform_0, window_bounds = array<i64: 128, 512>}, {pipeline_mode = #tpu.pipeline_mode<synchronous>, transform_indices = @transform_1, window_bounds = array<i64: 512, 128>}, {pipeline_mode = #tpu.pipeline_mode<synchronous>, transform_indices = @transform_2, window_bounds = array<i64: 1, 128>}, {transform_indices = @transform_3, window_bounds = array<i64: 8, 128>}]} {
    %c0 = arith.constant 0 : index
    %c0_0 = arith.constant 0 : index
    %0 = vector.load %arg1[%c0, %c0_0] : memref<128x512xbf16, #tpu.memory_space<vmem>>, vector<128x512xbf16>
    %c0_1 = arith.constant 0 : index
    %c0_2 = arith.constant 0 : index
    %1 = vector.load %arg2[%c0_1, %c0_2] : memref<512x128xbf16, #tpu.memory_space<vmem>>, vector<512x128xbf16>
    %cst = arith.constant dense<0.000000e+00> : vector<128x128xf32>
    %2 = tpu.matmul %0, %1, %cst {dimension_numbers = #tpu.dot_dimension_numbers<[1], [0], [0], [1], [0, 0, 1, 1], [], []>} : vector<128x512xbf16>, vector<512x128xbf16>, vector<128x128xf32> -> vector<128x128xf32>
    %3 = vector.shape_cast %2 : vector<128x128xf32> to vector<8x16x128xf32>
    %cst_3 = arith.constant dense<0.000000e+00> : vector<8x128xf32>
    %4 = vector.multi_reduction <add>, %3, %cst_3 [1] : vector<8x16x128xf32> to vector<8x128xf32>
    %c0_4 = arith.constant 0 : index
    %c0_5 = arith.constant 0 : index
    %5 = vector.load %arg3[%c0_4, %c0_5] : memref<1x128xf32, #tpu.memory_space<vmem>>, vector<1x128xf32>
    %6 = vector.broadcast %5 : vector<1x128xf32> to vector<8x128xf32>
    %7 = arith.addf %4, %6 : vector<8x128xf32>
    %c0_6 = arith.constant 0 : index
    %c0_7 = arith.constant 0 : index
    %8 = vector.load %arg4[%c0_6, %c0_7] : memref<8x128xf32, #tpu.memory_space<vmem>>, vector<8x128xf32>
    tpu.vector_store %arg4[%c0_6, %c0_7], %7 {strides = array<i32>} : memref<8x128xf32, #tpu.memory_space<vmem>>, vector<8x128xf32>,
    return
  }
  func.func @transform_0(%arg0: i32) -> (i32, i32) {
    %c0_i32 = arith.constant 0 : i32
    %c0_i32_0 = arith.constant 0 : i32
    return %arg0, %c0_i32 : i32, i32
  }
  func.func @transform_1(%arg0: i32) -> (i32, i32) {
    %c0_i32 = arith.constant 0 : i32
    %c0_i32_0 = arith.constant 0 : i32
    %c0_i32_1 = arith.constant 0 : i32
    return %c0_i32, %c0_i32_0 : i32, i32
  }
  func.func @transform_2(%arg0: i32) -> (i32, i32) {
    %c0_i32 = arith.constant 0 : i32
    %c0_i32_0 = arith.constant 0 : i32
    %c0_i32_1 = arith.constant 0 : i32
    return %c0_i32, %c0_i32_0 : i32, i32
  }
  func.func @transform_3(%arg0: i32) -> (i32, i32) {
    %c0_i32 = arith.constant 0 : i32
    %c0_i32_0 = arith.constant 0 : i32
    return %arg0, %c0_i32 : i32, i32
  }
}

</mosaic_0001>

<bundles_post_ra>
// kernel: tpu_custom_call.1
= control target key start
LH: loop header
LB: loop body
LE: loop exit
PB: predicated region body
PF: predicated region fallthrough
CT: control target
= control target key end

     0   :  { %8 = vsyncpa [#allocation3], 0  ;;  %s1232_s0 = inlined_call_operand.hbm [shape: bf16[128,512], index: 0, kind: input, shape index: {}]   ;;  %s1233_s1 = inlined_call_operand.hbm [shape: bf16[512,128], index: 1, kind: input, shape index: {}]   ;;  %s1234_s2 = inlined_call_operand.vmem [shape: f32[1,128], index: 2, kind: input, shape index: {}]   ;;  %s1235_s3 = inlined_call_operand.hbm [shape: f32[8,128], index: 3, kind: output, shape index: {}]  }
   0x1   :  { %9 = vsyncpa [#allocation6], 0 }
   0x2   :  { %10 = vsyncpa [#allocation4], 0  ;;  %s1156_s12 = smov [#allocation2]   ;;  %s1084_s16 = scalar_lea.hbm %s1232_s0, 4096 }
   0x3   :  { %s16_s13 = sshll.u32 %s1156_s12, 4  ;;  %p1085_p0 = scmp.ne.s32.totalorder %s1232_s0, %s1084_s16  ;;  %s17_s13 = int_to_ptr.vmem [resolvable:$true] %s16_s13 }
   0x4   :  { %p1088_p1 = scmp.lt.u32.totalorder %s1084_s16, %s1232_s0 }
   0x6   :  { %p1090_p2 = pnand %p1088_p1, %p1085_p0 }
   0x8   :  { %1093 = shalt.err (!%p1090_p2)
}
   0x9   :  { %s1094_s21 = scalar_lea.vmem %s17_s13, 4096  ;;  %p1099_p4 = scmp.lt.s32.totalorder %s17_s13, %s17_s13 }
   0xa   :  { %p1095_p3 = scmp.ne.s32.totalorder %s17_s13, %s1094_s21  ;;  %p1100_p5 = scmp.lt.s32.totalorder %s1094_s21, %s1094_s21 }
   0xc   :  { %p1101_p6 = por %p1100_p5, %p1099_p4 }
   0xe   :  { %p1102_p7 = pnand %p1101_p6, %p1095_p3 }
  0x10   :  { %1105 = shalt.err (!%p1102_p7)
}
  0x11   :  { %s1157_s22 = smov 256   ;;  %s1158_s23 = smov 16  }
  0x12   :  { %22 = dma.hbm_to_vmem [thread:$0]  %s1232_s0, 4096, %s17_s13, [#allocation3], %s1157_s22, %s1157_s22, %s1158_s23  }
  0x13   :  { %s1159_s26 = smov [#allocation5]   ;;  %s1106_s30 = scalar_lea.hbm %s1233_s1, 4096 }
  0x14   :  { %s28_s27 = sshll.u32 %s1159_s26, 4  ;;  %p1107_p8 = scmp.ne.s32.totalorder %s1233_s1, %s1106_s30  ;;  %s29_s27 = int_to_ptr.vmem [resolvable:$true] %s28_s27 }
  0x15   :  { %p1110_p9 = scmp.lt.u32.totalorder %s1106_s30, %s1233_s1 }
  0x17   :  { %p1112_p10 = pnand %p1110_p9, %p1107_p8 }
  0x19   :  { %1115 = shalt.err (!%p1112_p10)
}
  0x1a   :  { %s1116_s8 = scalar_lea.vmem %s29_s27, 4096  ;;  %p1121_p12 = scmp.lt.s32.totalorder %s29_s27, %s29_s27 }
  0x1b   :  { %p1117_p11 = scmp.ne.s32.totalorder %s29_s27, %s1116_s8  ;;  %p1122_p13 = scmp.lt.s32.totalorder %s1116_s8, %s1116_s8 }
  0x1d   :  { %p1123_p0 = por %p1122_p13, %p1121_p12 }
  0x1f   :  { %p1124_p1 = pnand %p1123_p0, %p1117_p11 }
  0x21   :  { %1127 = shalt.err (!%p1124_p1)
}
  0x22   :  { %s1160_s0 = smov 64   ;;  %s1161_s9 = smov 4  }
  0x23   :  { %34 = dma.hbm_to_vmem [thread:$0]  %s1233_s1, 4096, %s29_s27, [#allocation6], %s1160_s0, %s1160_s0, %s1161_s9  }
  0x24   :  { %1150 = dma.done.wait [#allocation3], 4096  }
  0x25   :  { %1151 = vsyncadd [#allocation3], 4294963200 }
  0x26   :  { %1152 = dma.done.wait [#allocation6], 4096  }
  0x27   :  { %1153 = vsyncadd [#allocation6], 4294963200  ;;  %v1004_v0 = vld [vmem:[#allocation5 + $0x40] sm:$0xff]   ;;  %v1008_v4 = vld [vmem:[#allocation5 + $0x48] sm:$0xff]   ;;  %vm766_vm0 = vcmask 1041409   ;;  %vm769_vm1 = vcmask 1042434  }
  0x28   :  { %v1005_v1 = vld [vmem:[#allocation5 + $0xc0] sm:$0xff]   ;;  %869 = vmatprep.subr.bf16.mxu0 %v1004_v0  ;;  %v1009_v5 = vld [vmem:[#allocation5 + $0xc8] sm:$0xff]   ;;  %v1012_v8 = vld [vmem:[#allocation5 + $0x50] sm:$0xff]   ;;  %vm772_vm2 = vcmask 1043459   ;;  %vm775_vm3 = vcmask 1044484   ;;  %vm778_vm4 = vcmask 1045509  }
  0x29   :  { %v1006_v2 = vld [vmem:[#allocation5] sm:$0xff]   ;;  %933 = vmatprep.subr.bf16.mxu1 %v1005_v1  ;;  %v1010_v6 = vld [vmem:[#allocation5 + $0x8] sm:$0xff]   ;;  %v1013_v9 = vld [vmem:[#allocation5 + $0xd0] sm:$0xff]   ;;  %vm781_vm5 = vcmask 1046534   ;;  %vm784_vm6 = vcmask 1047559  }
  0x2a   :  { %v1007_v3 = vld [vmem:[#allocation5 + $0x80] sm:$0xff]   ;;  %870 = vmatpush3.bf16.msra.mxu0 %v1006_v2  ;;  %v1011_v7 = vld [vmem:[#allocation5 + $0x88] sm:$0xff]   ;;  %v1014_v10 = vld [vmem:[#allocation5 + $0x10] sm:$0xff]  }
  0x2b   :  { %934 = vmatpush3.bf16.msra.mxu1 %v1007_v3  ;;  %871 = vmatprep.subr.bf16.mxu0 %v1008_v4  ;;  %v1015_v11 = vld [vmem:[#allocation5 + $0x90] sm:$0xff]   ;;  %v1016_v12 = vld [vmem:[#allocation5 + $0x58] sm:$0xff]   ;;  %v1020_v16 = vld [vmem:[#allocation5 + $0x60] sm:$0xff]  }
  0x2c   :  { %935 = vmatprep.subr.bf16.mxu1 %v1009_v5  ;;  %v1017_v13 = vld [vmem:[#allocation5 + $0xd8] sm:$0xff]   ;;  %v1021_v17 = vld [vmem:[#allocation5 + $0xe0] sm:$0xff]   ;;  %v1024_v20 = vld [vmem:[#allocation5 + $0x68] sm:$0xff]  }
  0x2d   :  { %v1018_v14 = vld [vmem:[#allocation5 + $0x18] sm:$0xff]   ;;  %v1022_v18 = vld [vmem:[#allocation5 + $0x20] sm:$0xff]   ;;  %v1025_v21 = vld [vmem:[#allocation5 + $0xe8] sm:$0xff]  }
  0x2e   :  { %872 = vmatpush3.bf16.msra.mxu0 %v1010_v6  ;;  %v1019_v15 = vld [vmem:[#allocation5 + $0x98] sm:$0xff]   ;;  %v1023_v19 = vld [vmem:[#allocation5 + $0xa0] sm:$0xff]   ;;  %v1026_v22 = vld [vmem:[#allocation5 + $0x28] sm:$0xff]  }
  0x2f   :  { %936 = vmatpush3.bf16.msra.mxu1 %v1011_v7  ;;  %873 = vmatprep.subr.bf16.mxu0 %v1012_v8  ;;  %v1027_v23 = vld [vmem:[#allocation5 + $0xa8] sm:$0xff]   ;;  %v1028_v24 = vld [vmem:[#allocation5 + $0x70] sm:$0xff]   ;;  %v1032_v28 = vld [vmem:[#allocation5 + $0x78] sm:$0xff]  }
  0x30   :  { %937 = vmatprep.subr.bf16.mxu1 %v1013_v9  ;;  %v1029_v25 = vld [vmem:[#allocation5 + $0xf0] sm:$0xff]   ;;  %v1033_v29 = vld [vmem:[#allocation5 + $0xf8] sm:$0xff]  }
  0x31   :  { %v1030_v26 = vld [vmem:[#allocation5 + $0x30] sm:$0xff]   ;;  %v1034_v30 = vld [vmem:[#allocation5 + $0x38] sm:$0xff]  }
  0x32   :  { %874 = vmatpush3.bf16.msra.mxu0 %v1014_v10  ;;  %v1031_v27 = vld [vmem:[#allocation5 + $0xb0] sm:$0xff]   ;;  %v1035_v31 = vld [vmem:[#allocation5 + $0xb8] sm:$0xff]  }
  0x33   :  { %938 = vmatpush3.bf16.msra.mxu1 %v1015_v11  ;;  %875 = vmatprep.subr.bf16.mxu0 %v1016_v12  ;;  %v1036_v32 = vld [vmem:[#allocation2] ss:$16 sps:$4 sm:$0xff]   ;;  %v1038_v33 = vld [vmem:[#allocation2 + $0x4] ss:$16 sps:$4 sm:$0xff]   ;;  %v1039_v34 = vld [vmem:[#allocation2 + $0x8] ss:$16 sps:$4 sm:$0xff]  }
  0x34   :  { %939 = vmatprep.subr.bf16.mxu1 %v1017_v13  ;;  %v1041_v35 = vld [vmem:[#allocation2 + $0xc] ss:$16 sps:$4 sm:$0xff]   ;;  %524 = vmatprep.mubr.bf16.mxu0 %v1038_v33  ;;  %v1042_v36 = vld [vmem:[#allocation2 + $0x24] ss:$16 sps:$4 sm:$0xff]   ;;  %v1046_v38 = vld [vmem:[#allocation2 + $0x20] ss:$16 sps:$4 sm:$0xff]  }
  0x35   :  { %621 = vmatprep.mubr.bf16.mxu1 %v1041_v35  ;;  %v1044_v37 = vld [vmem:[#allocation2 + $0x2c] ss:$16 sps:$4 sm:$0xff]   ;;  %v1047_v39 = vld [vmem:[#allocation2 + $0x28] ss:$16 sps:$4 sm:$0xff]   ;;  %v1048_v40 = vld [vmem:[#allocation2 + $0x44] ss:$16 sps:$4 sm:$0xff]  }
  0x36   :  { %876 = vmatpush3.bf16.msra.mxu0 %v1018_v14  ;;  %v1050_v41 = vld [vmem:[#allocation2 + $0x4c] ss:$16 sps:$4 sm:$0xff]   ;;  %v1052_v42 = vld [vmem:[#allocation2 + $0x40] ss:$16 sps:$4 sm:$0xff]   ;;  %v1053_v43 = vld [vmem:[#allocation2 + $0x48] ss:$16 sps:$4 sm:$0xff]  }
  0x37   :  { %940 = vmatpush3.bf16.msra.mxu1 %v1019_v15  ;;  %877 = vmatprep.subr.bf16.mxu0 %v1020_v16  ;;  %v1054_v44 = vld [vmem:[#allocation2 + $0x64] ss:$16 sps:$4 sm:$0xff]   ;;  %v1056_v45 = vld [vmem:[#allocation2 + $0x6c] ss:$16 sps:$4 sm:$0xff]   ;;  %v1058_v46 = vld [vmem:[#allocation2 + $0x60] ss:$16 sps:$4 sm:$0xff]  }
  0x38   :  { %941 = vmatprep.subr.bf16.mxu1 %v1021_v17  ;;  %v1059_v47 = vld [vmem:[#allocation2 + $0x68] ss:$16 sps:$4 sm:$0xff]   ;;  %v1060_v48 = vld [vmem:[#allocation2 + $0x84] ss:$16 sps:$4 sm:$0xff]   ;;  %v1062_v49 = vld [vmem:[#allocation2 + $0x8c] ss:$16 sps:$4 sm:$0xff]  }
  0x39   :  { %v1064_v50 = vld [vmem:[#allocation2 + $0x80] ss:$16 sps:$4 sm:$0xff]   ;;  %v1065_v51 = vld [vmem:[#allocation2 + $0x88] ss:$16 sps:$4 sm:$0xff]   ;;  %v1066_v52 = vld [vmem:[#allocation2 + $0xa4] ss:$16 sps:$4 sm:$0xff]  }
  0x3a   :  { %878 = vmatpush3.bf16.msra.mxu0 %v1022_v18  ;;  %v1068_v53 = vld [vmem:[#allocation2 + $0xac] ss:$16 sps:$4 sm:$0xff]   ;;  %v1070_v54 = vld [vmem:[#allocation2 + $0xa0] ss:$16 sps:$4 sm:$0xff]   ;;  %v1071_v55 = vld [vmem:[#allocation2 + $0xa8] ss:$16 sps:$4 sm:$0xff]  }
  0x3b   :  { %942 = vmatpush3.bf16.msra.mxu1 %v1023_v19  ;;  %879 = vmatprep.subr.bf16.mxu0 %v1024_v20  ;;  %v1072_v56 = vld [vmem:[#allocation2 + $0xc4] ss:$16 sps:$4 sm:$0xff]   ;;  %v1074_v57 = vld [vmem:[#allocation2 + $0xcc] ss:$16 sps:$4 sm:$0xff]   ;;  %v1076_v58 = vld [vmem:[#allocation2 + $0xc0] ss:$16 sps:$4 sm:$0xff]  }
  0x3c   :  { %943 = vmatprep.subr.bf16.mxu1 %v1025_v21  ;;  %v1077_v59 = vld [vmem:[#allocation2 + $0xc8] ss:$16 sps:$4 sm:$0xff]   ;;  %v1078_v60 = vld [vmem:[#allocation2 + $0xe4] ss:$16 sps:$4 sm:$0xff]   ;;  %v1080_v61 = vld [vmem:[#allocation2 + $0xec] ss:$16 sps:$4 sm:$0xff]  }
  0x3d   :  { %v1082_v62 = vld [vmem:[#allocation2 + $0xe0] ss:$16 sps:$4 sm:$0xff]   ;;  %v1083_v63 = vld [vmem:[#allocation2 + $0xe8] ss:$16 sps:$4 sm:$0xff]  }
  0x3e   :  { %880 = vmatpush3.bf16.msra.mxu0 %v1026_v22 }
  0x3f   :  { %944 = vmatpush3.bf16.msra.mxu1 %v1027_v23  ;;  %881 = vmatprep.subr.bf16.mxu0 %v1028_v24 }
  0x40   :  { %945 = vmatprep.subr.bf16.mxu1 %v1029_v25 }
  0x42   :  { %882 = vmatpush3.bf16.msra.mxu0 %v1030_v26 }
  0x43   :  { %946 = vmatpush3.bf16.msra.mxu1 %v1031_v27  ;;  %883 = vmatprep.subr.bf16.mxu0 %v1032_v28 }
  0x44   :  { %947 = vmatprep.subr.bf16.mxu1 %v1033_v29 }
  0x46   :  { %884 = vmatpush3.bf16.msra.mxu0 %v1034_v30 }
  0x47   :  { %948 = vmatpush3.bf16.msra.mxu1 %v1035_v31 }
  0x49   :  { %525 = vmatmul.mubr.bf16.vlgmr.msra.gmra.mrb[0].mxu0 %v1036_v32 }
  0x4a   :  { %622 = vmatmul.mubr.bf16.vlgmr.msra.gmra.mrb[0].mxu1 %v1039_v34  ;;  %532 = vmatprep.mubr.bf16.mxu0 %v1042_v36 }
  0x4b   :  { %629 = vmatprep.mubr.bf16.mxu1 %v1044_v37 }
  0x51   :  { %533 = vmatmul.mubr.bf16.gmra.mrb[4].mxu0 %v1046_v38 }
  0x52   :  { %630 = vmatmul.mubr.bf16.gmra.mrb[4].mxu1 %v1047_v39  ;;  %540 = vmatprep.mubr.bf16.mxu0 %v1048_v40 }
  0x53   :  { %637 = vmatprep.mubr.bf16.mxu1 %v1050_v41 }
  0x59   :  { %541 = vmatmul.mubr.bf16.gmra.mrb[8].mxu0 %v1052_v42 }
  0x5a   :  { %638 = vmatmul.mubr.bf16.gmra.mrb[8].mxu1 %v1053_v43  ;;  %548 = vmatprep.mubr.bf16.mxu0 %v1054_v44 }
  0x5b   :  { %645 = vmatprep.mubr.bf16.mxu1 %v1056_v45 }
  0x61   :  { %549 = vmatmul.mubr.bf16.gmra.mrb[12].mxu0 %v1058_v46 }
  0x62   :  { %646 = vmatmul.mubr.bf16.gmra.mrb[12].mxu1 %v1059_v47  ;;  %556 = vmatprep.mubr.bf16.mxu0 %v1060_v48 }
  0x63   :  { %653 = vmatprep.mubr.bf16.mxu1 %v1062_v49 }
  0x69   :  { %557 = vmatmul.mubr.bf16.gmra.mrb[16].mxu0 %v1064_v50 }
  0x6a   :  { %654 = vmatmul.mubr.bf16.gmra.mrb[16].mxu1 %v1065_v51  ;;  %564 = vmatprep.mubr.bf16.mxu0 %v1066_v52 }
  0x6b   :  { %661 = vmatprep.mubr.bf16.mxu1 %v1068_v53 }
  0x71   :  { %565 = vmatmul.mubr.bf16.gmra.mrb[20].mxu0 %v1070_v54 }
  0x72   :  { %662 = vmatmul.mubr.bf16.gmra.mrb[20].mxu1 %v1071_v55  ;;  %572 = vmatprep.mubr.bf16.mxu0 %v1072_v56 }
  0x73   :  { %669 = vmatprep.mubr.bf16.mxu1 %v1074_v57 }
  0x79   :  { %573 = vmatmul.mubr.bf16.gmra.mrb[24].mxu0 %v1076_v58 }
  0x7a   :  { %670 = vmatmul.mubr.bf16.gmra.mrb[24].mxu1 %v1077_v59  ;;  %580 = vmatprep.mubr.bf16.mxu0 %v1078_v60 }
  0x7b   :  { %677 = vmatprep.mubr.bf16.mxu1 %v1080_v61 }
  0x81   :  { %581 = vmatmul.mubr.bf16.gmra.mrb[28].mxu0 %v1082_v62 }
  0x82   :  { %678 = vmatmul.mubr.bf16.gmra.mrb[28].mxu1 %v1083_v63 }
 0x11c   :  { %v885_v0 = vpop.f32.mrb[0].mxu0 }
 0x11d   :  { %v949_v1 = vpop.f32.mrb[0].mxu1  ;;  %v886_v2 = vpop.f32.mrb[1].mxu0 }
 0x11e   :  { %v887_v3 = vadd.f32 %v886_v2, %v885_v0  ;;  %v950_v4 = vpop.f32.mrb[1].mxu1  ;;  %v888_v5 = vpop.f32.mrb[2].mxu0 }
 0x11f   :  { %v951_v6 = vadd.f32 %v950_v4, %v949_v1  ;;  %v952_v7 = vpop.f32.mrb[2].mxu1  ;;  %v889_v8 = vpop.f32.mrb[3].mxu0 }
 0x120   :  { %v890_v9 = vadd.f32 %v889_v8, %v888_v5  ;;  %v953_v10 = vpop.f32.mrb[3].mxu1  ;;  %v1210_v8 = vld [vmem:[%s1234_s2] ss:$0 sm:$0xff]  ;;  %s1162_s2 = smov [#allocation7]  }
 0x121   :  { %v624_v11 = vadd.f32 %v951_v6, %v887_v3  ;;  %v954_v12 = vadd.f32 %v953_v10, %v952_v7  ;;  %s794_s13 = sshll.u32 %s1162_s2, 4  ;;  %s795_s13 = int_to_ptr.vmem [resolvable:$true] %s794_s13 }
 0x122   :  { %s1128_s14 = scalar_lea.vmem %s795_s13, 128  ;;  %p1133_p3 = scmp.lt.s32.totalorder %s795_s13, %s795_s13 }
 0x123   :  { %v627_v13 = vadd.f32 %v954_v12, %v890_v9  ;;  %p1129_p2 = scmp.ne.s32.totalorder %s795_s13, %s1128_s14  ;;  %p1134_p4 = scmp.lt.s32.totalorder %s1128_s14, %s1128_s14 }
 0x124   :  { %v891_v14 = vpop.f32.mrb[4].mxu0 }
 0x125   :  { %v686_v15 = vadd.f32 %v627_v13, %v624_v11  ;;  %v955_v16 = vpop.f32.mrb[4].mxu1  ;;  %v892_v17 = vpop.f32.mrb[5].mxu0  ;;  %p1135_p5 = por %p1134_p4, %p1133_p3 }
 0x126   :  { %v893_v18 = vadd.f32 %v892_v17, %v891_v14  ;;  %v956_v19 = vpop.f32.mrb[5].mxu1  ;;  %v894_v20 = vpop.f32.mrb[6].mxu0 }
 0x127   :  { %v687_v21 = vrot.slane %v686_v15, 4  ;;  %v957_v22 = vadd.f32 %v956_v19, %v955_v16  ;;  %v958_v23 = vpop.f32.mrb[6].mxu1  ;;  %v895_v24 = vpop.f32.mrb[7].mxu0  ;;  %p1136_p6 = pnand %p1135_p5, %p1129_p2 }
 0x128   :  { %v896_v25 = vadd.f32 %v895_v24, %v894_v20  ;;  %v959_v26 = vpop.f32.mrb[7].mxu1 }
 0x129   :  { %v688_v27 = vadd.f32 %v687_v21, %v686_v15  ;;  %v632_v28 = vadd.f32 %v957_v22, %v893_v18  ;;  %v960_v29 = vadd.f32 %v959_v26, %v958_v23 }
 0x12b   :  { %v635_v30 = vadd.f32 %v960_v29, %v896_v25  ;;  %v689_v31 = vrot.slane %v688_v27, 2 }
 0x12c   :  { %v897_v32 = vpop.f32.mrb[8].mxu0 }
 0x12d   :  { %v693_v33 = vadd.f32 %v635_v30, %v632_v28  ;;  %v961_v34 = vpop.f32.mrb[8].mxu1  ;;  %v898_v35 = vpop.f32.mrb[9].mxu0  ;;  %v690_v43 = vadd.f32 %v689_v31, %v688_v27 }
 0x12e   :  { %v899_v36 = vadd.f32 %v898_v35, %v897_v32  ;;  %v962_v37 = vpop.f32.mrb[9].mxu1  ;;  %v900_v38 = vpop.f32.mrb[10].mxu0 }
 0x12f   :  { %v694_v39 = vrot.slane %v693_v33, 4  ;;  %v963_v40 = vadd.f32 %v962_v37, %v961_v34  ;;  %v964_v41 = vpop.f32.mrb[10].mxu1  ;;  %v901_v42 = vpop.f32.mrb[11].mxu0  ;;  %v691_v51 = vrot.slane %v690_v43, 1 }
 0x130   :  { %v902_v44 = vadd.f32 %v901_v42, %v900_v38  ;;  %v965_v45 = vpop.f32.mrb[11].mxu1 }
 0x131   :  { %v695_v46 = vadd.f32 %v694_v39, %v693_v33  ;;  %v640_v47 = vadd.f32 %v963_v40, %v899_v36  ;;  %v966_v48 = vadd.f32 %v965_v45, %v964_v41  ;;  %v692_v1 = vadd.f32 %v691_v51, %v690_v43 }
 0x133   :  { %v696_v49 = vrot.slane %v695_v46, 2  ;;  %v643_v50 = vadd.f32 %v966_v48, %v902_v44  ;;  %v749_v13 = vadd.f32 %v1210_v8, %v692_v1 }
 0x134   :  { %v903_v52 = vpop.f32.mrb[12].mxu0 }
 0x135   :  { %v697_v53 = vadd.f32 %v696_v49, %v695_v46  ;;  %v700_v54 = vadd.f32 %v643_v50, %v640_v47  ;;  %v967_v55 = vpop.f32.mrb[12].mxu1  ;;  %v904_v56 = vpop.f32.mrb[13].mxu0 }
 0x136   :  { %v905_v57 = vadd.f32 %v904_v56, %v903_v52  ;;  %v968_v58 = vpop.f32.mrb[13].mxu1  ;;  %v906_v59 = vpop.f32.mrb[14].mxu0 }
 0x137   :  { %v698_v60 = vrot.slane %v697_v53, 1  ;;  %v701_v61 = vrot.slane %v700_v54, 4  ;;  %v969_v62 = vadd.f32 %v968_v58, %v967_v55  ;;  %v970_v63 = vpop.f32.mrb[14].mxu1  ;;  %v907_v0 = vpop.f32.mrb[15].mxu0 }
 0x138   :  { %v908_v2 = vadd.f32 %v907_v0, %v906_v59  ;;  %v971_v3 = vpop.f32.mrb[15].mxu1 }
 0x139   :  { %v699_v4 = vadd.f32 %v698_v60, %v697_v53  ;;  %v702_v5 = vadd.f32 %v701_v61, %v700_v54  ;;  %v648_v6 = vadd.f32 %v969_v62, %v905_v57  ;;  %v972_v7 = vadd.f32 %v971_v3, %v970_v63 }
 0x13b   :  { %v750_v9 = vadd.f32 %v1210_v8, %v699_v4  ;;  %v703_v10 = vrot.slane %v702_v5, 2  ;;  %v651_v11 = vadd.f32 %v972_v7, %v908_v2 }
 0x13c   :  { %v909_v12 = vpop.f32.mrb[16].mxu0 }
 0x13d   :  { %v765_v14 = vrot.slane %v750_v9, 7  ;;  %v704_v15 = vadd.f32 %v703_v10, %v702_v5  ;;  %v707_v16 = vadd.f32 %v651_v11, %v648_v6  ;;  %v973_v17 = vpop.f32.mrb[16].mxu1  ;;  %v910_v18 = vpop.f32.mrb[17].mxu0 }
 0x13e   :  { %v911_v19 = vadd.f32 %v910_v18, %v909_v12  ;;  %v974_v20 = vpop.f32.mrb[17].mxu1  ;;  %v912_v21 = vpop.f32.mrb[18].mxu0 }
 0x13f   :  { %v705_v22 = vrot.slane %v704_v15, 1  ;;  %v708_v23 = vrot.slane %v707_v16, 4  ;;  %v975_v24 = vadd.f32 %v974_v20, %v973_v17  ;;  %v976_v25 = vpop.f32.mrb[18].mxu1  ;;  %v913_v26 = vpop.f32.mrb[19].mxu0  ;;  %v767_v27 = vsel %vm766_vm0, %v765_v14, %v749_v13 }
 0x140   :  { %v914_v28 = vadd.f32 %v913_v26, %v912_v21  ;;  %v977_v29 = vpop.f32.mrb[19].mxu1 }
 0x141   :  { %v706_v30 = vadd.f32 %v705_v22, %v704_v15  ;;  %v709_v31 = vadd.f32 %v708_v23, %v707_v16  ;;  %v656_v32 = vadd.f32 %v975_v24, %v911_v19  ;;  %v978_v33 = vadd.f32 %v977_v29, %v976_v25 }
 0x143   :  { %v751_v34 = vadd.f32 %v1210_v8, %v706_v30  ;;  %v710_v35 = vrot.slane %v709_v31, 2  ;;  %v659_v36 = vadd.f32 %v978_v33, %v914_v28 }
 0x144   :  { %v915_v37 = vpop.f32.mrb[20].mxu0 }
 0x145   :  { %v768_v38 = vrot.slane %v751_v34, 6  ;;  %v711_v39 = vadd.f32 %v710_v35, %v709_v31  ;;  %v714_v40 = vadd.f32 %v659_v36, %v656_v32  ;;  %v979_v41 = vpop.f32.mrb[20].mxu1  ;;  %v916_v42 = vpop.f32.mrb[21].mxu0 }
 0x146   :  { %v917_v43 = vadd.f32 %v916_v42, %v915_v37  ;;  %v980_v44 = vpop.f32.mrb[21].mxu1  ;;  %v918_v45 = vpop.f32.mrb[22].mxu0 }
 0x147   :  { %v712_v46 = vrot.slane %v711_v39, 1  ;;  %v715_v47 = vrot.slane %v714_v40, 4  ;;  %v981_v48 = vadd.f32 %v980_v44, %v979_v41  ;;  %v982_v49 = vpop.f32.mrb[22].mxu1  ;;  %v919_v50 = vpop.f32.mrb[23].mxu0  ;;  %v770_v51 = vsel %vm769_vm1, %v768_v38, %v767_v27 }
 0x148   :  { %v920_v52 = vadd.f32 %v919_v50, %v918_v45  ;;  %v983_v53 = vpop.f32.mrb[23].mxu1 }
 0x149   :  { %v713_v54 = vadd.f32 %v712_v46, %v711_v39  ;;  %v716_v55 = vadd.f32 %v715_v47, %v714_v40  ;;  %v664_v56 = vadd.f32 %v981_v48, %v917_v43  ;;  %v984_v57 = vadd.f32 %v983_v53, %v982_v49 }
 0x14b   :  { %v752_v58 = vadd.f32 %v1210_v8, %v713_v54  ;;  %v717_v59 = vrot.slane %v716_v55, 2  ;;  %v667_v60 = vadd.f32 %v984_v57, %v920_v52 }
 0x14c   :  { %v921_v61 = vpop.f32.mrb[24].mxu0 }
 0x14d   :  { %v771_v62 = vrot.slane %v752_v58, 5  ;;  %v718_v63 = vadd.f32 %v717_v59, %v716_v55  ;;  %v721_v0 = vadd.f32 %v667_v60, %v664_v56  ;;  %v985_v1 = vpop.f32.mrb[24].mxu1  ;;  %v922_v2 = vpop.f32.mrb[25].mxu0 }
 0x14e   :  { %v923_v3 = vadd.f32 %v922_v2, %v921_v61  ;;  %v986_v4 = vpop.f32.mrb[25].mxu1  ;;  %v924_v5 = vpop.f32.mrb[26].mxu0 }
 0x14f   :  { %v719_v6 = vrot.slane %v718_v63, 1  ;;  %v722_v7 = vrot.slane %v721_v0, 4  ;;  %v987_v9 = vadd.f32 %v986_v4, %v985_v1  ;;  %v988_v10 = vpop.f32.mrb[26].mxu1  ;;  %v925_v11 = vpop.f32.mrb[27].mxu0  ;;  %v773_v12 = vsel %vm772_vm2, %v771_v62, %v770_v51 }
 0x150   :  { %v926_v13 = vadd.f32 %v925_v11, %v924_v5  ;;  %v989_v14 = vpop.f32.mrb[27].mxu1 }
 0x151   :  { %v720_v15 = vadd.f32 %v719_v6, %v718_v63  ;;  %v723_v16 = vadd.f32 %v722_v7, %v721_v0  ;;  %v672_v17 = vadd.f32 %v987_v9, %v923_v3  ;;  %v990_v18 = vadd.f32 %v989_v14, %v988_v10 }
 0x153   :  { %v753_v19 = vadd.f32 %v1210_v8, %v720_v15  ;;  %v724_v20 = vrot.slane %v723_v16, 2  ;;  %v675_v21 = vadd.f32 %v990_v18, %v926_v13 }
 0x154   :  { %v927_v22 = vpop.f32.mrb[28].mxu0 }
 0x155   :  { %v774_v23 = vrot.slane %v753_v19, 4  ;;  %v725_v24 = vadd.f32 %v724_v20, %v723_v16  ;;  %v728_v25 = vadd.f32 %v675_v21, %v672_v17  ;;  %v991_v26 = vpop.f32.mrb[28].mxu1  ;;  %v928_v27 = vpop.f32.mrb[29].mxu0 }
 0x156   :  { %v929_v28 = vadd.f32 %v928_v27, %v927_v22  ;;  %v992_v29 = vpop.f32.mrb[29].mxu1  ;;  %v930_v30 = vpop.f32.mrb[30].mxu0 }
 0x157   :  { %v726_v31 = vrot.slane %v725_v24, 1  ;;  %v729_v32 = vrot.slane %v728_v25, 4  ;;  %v993_v33 = vadd.f32 %v992_v29, %v991_v26  ;;  %v994_v34 = vpop.f32.mrb[30].mxu1  ;;  %v931_v35 = vpop.f32.mrb[31].mxu0  ;;  %v776_v36 = vsel %vm775_vm3, %v774_v23, %v773_v12 }
 0x158   :  { %v932_v37 = vadd.f32 %v931_v35, %v930_v30  ;;  %v995_v38 = vpop.f32.mrb[31].mxu1 }
 0x159   :  { %v727_v39 = vadd.f32 %v726_v31, %v725_v24  ;;  %v730_v40 = vadd.f32 %v729_v32, %v728_v25  ;;  %v680_v41 = vadd.f32 %v993_v33, %v929_v28  ;;  %v996_v42 = vadd.f32 %v995_v38, %v994_v34 }
 0x15b   :  { %v731_v43 = vrot.slane %v730_v40, 2  ;;  %v683_v44 = vadd.f32 %v996_v42, %v932_v37  ;;  %v754_v45 = vadd.f32 %v1210_v8, %v727_v39 }
 0x15d   :  { %v732_v46 = vadd.f32 %v731_v43, %v730_v40  ;;  %v735_v47 = vadd.f32 %v683_v44, %v680_v41  ;;  %v777_v48 = vrot.slane %v754_v45, 3 }
 0x15f   :  { %v733_v49 = vrot.slane %v732_v46, 1  ;;  %v736_v50 = vrot.slane %v735_v47, 4  ;;  %v779_v51 = vsel %vm778_vm4, %v777_v48, %v776_v36 }
 0x161   :  { %v734_v52 = vadd.f32 %v733_v49, %v732_v46  ;;  %v737_v53 = vadd.f32 %v736_v50, %v735_v47 }
 0x163   :  { %v738_v54 = vrot.slane %v737_v53, 2  ;;  %v755_v55 = vadd.f32 %v1210_v8, %v734_v52 }
 0x165   :  { %v739_v56 = vadd.f32 %v738_v54, %v737_v53  ;;  %v780_v57 = vrot.slane %v755_v55, 2 }
 0x167   :  { %v740_v58 = vrot.slane %v739_v56, 1  ;;  %v782_v59 = vsel %vm781_vm5, %v780_v57, %v779_v51 }
 0x169   :  { %v741_v60 = vadd.f32 %v740_v58, %v739_v56 }
 0x16b   :  { %v756_v61 = vadd.f32 %v1210_v8, %v741_v60 }
 0x16d   :  { %v783_v62 = vrot.slane %v756_v61, 1 }
 0x16f   :  { %v785_v63 = vsel %vm784_vm6, %v783_v62, %v782_v59 }
 0x170   :  { %787 = vst [vmem:[#allocation7] sm:$0xff] %v785_v63 }
 0x171   :  { %1139 = shalt.err (!%p1136_p6)
}
 0x172   :  { %s1140_s17 = scalar_lea.hbm %s1235_s3, 128 }
 0x173   :  { %p1141_p7 = scmp.ne.s32.totalorder %s1235_s3, %s1140_s17  ;;  %p1144_p8 = scmp.lt.u32.totalorder %s1140_s17, %s1235_s3 }
 0x175   :  { %p1146_p9 = pnand %p1144_p8, %p1141_p7 }
 0x177   :  { %1149 = shalt.err (!%p1146_p9)
}
 0x178   :  { %797 = dma.vmem_to_hbm [thread:$0]  %s795_s13, 128, %s1235_s3, [#allocation4]  }
 0x179   :  { %1154 = dma.done.wait [#allocation4], 128  }
 0x17a   :  { %1155 = vsyncadd [#allocation4], 4294967168 }
 0x17b   :  { %801 = vsyncpa [#allocation3], 1 }
 0x17c   :  { %802 = vsyncpa [#allocation6], 1 }
 0x17d   :  { %803 = vsyncpa [#allocation4], 1 }

</bundles_post_ra>
